<compile_context>
chip_gen: v7x
topology: tpu7x:2x2x1
jax: 0.10.0
libtpu: 0.0.40
codegen_flags: <defaults>
</compile_context>

<pallas_src>
import functools

import jax
import jax.numpy as jnp
from jax import lax
from jax.experimental import pallas as pl
from jax.experimental.pallas import tpu as pltpu


def _round_up(x, m):
    return ((x + m - 1) // m) * m


def _focal_partial_kernel(x_ref, y_ref, out_ref, acc_ref, *,
                          alpha, gamma, binary, M, N, TM, TN):
    i = pl.program_id(0)
    j = pl.program_id(1)

    @pl.when(j == 0)
    def _():
        acc_ref[...] = jnp.zeros_like(acc_ref)

    # Upcast in-kernel so narrow dtypes (bf16 logits, int8/bool labels) stay
    # narrow in HBM.
    x = x_ref[...].astype(jnp.float32)
    y = y_ref[...].astype(jnp.float32)

    # Numerically stable binary_cross_entropy_with_logits (reduction='none'):
    #   bce = max(x, 0) - x*y + log1p(exp(-|x|))      (>= 0 by construction)
    t = jnp.exp(-jnp.abs(x))                 # EUP #1
    bce = jnp.maximum(x, 0.0) - x * y + jnp.log1p(t)   # EUP #2 (log1p)

    if binary:
        # Hard {0,1} labels: exp(-bce) == select(sign(x) matches y, 1, t)/(1+t).
        # Saves the third transcendental; reciprocal goes to the (cheap) EUP
        # approx path.
        match = (x >= 0.0) == (y > 0.5)
        pt = jnp.where(match, 1.0, t) * pl.reciprocal(1.0 + t, approx=True)
    else:
        pt = jnp.exp(-bce)                   # EUP #3 (soft labels only)

    one_minus_pt = jnp.maximum(1.0 - pt, 0.0)   # guard tiny negative rounding

    g = float(gamma)
    if g == int(g) and g >= 0.0:
        # Integer gamma -> plain VPU multiplies instead of EUP exp(log(.)).
        w = lax.integer_pow(one_minus_pt, int(g))
    else:
        w = one_minus_pt ** g
    focal = alpha * w * bce

    # Ragged-edge masks, per axis, statically elided when shapes divide the
    # tiles.  NOTE: keep this as a where-select AFTER the math — it discards
    # garbage/NaN from padded regions instead of multiplying by it.
    mask = None
    if M % TM:
        row = lax.broadcasted_iota(jnp.int32, (TM, TN), 0) + i * TM
        mask = row < M
    if N % TN:
        col = lax.broadcasted_iota(jnp.int32, (TM, TN), 1) + j * TN
        cmask = col < N
        mask = cmask if mask is None else (mask & cmask)
    if mask is not None:
        focal = jnp.where(mask, focal, 0.0)

    # Fold the (TM, TN) tile into the (8, TN) vreg-shaped accumulator with an
    # unrolled per-8-row-strip accumulate: pure VPU adds on sublane-aligned
    # slices, no intermediate VMEM materialization, no per-step XLU reduce.
    strip = focal[0:8, :]
    for s in range(1, TM // 8):
        strip = strip + focal[s * 8:(s + 1) * 8, :]
    acc_ref[...] += strip

    @pl.when(j == pl.num_programs(1) - 1)
    def _():
        # Lane-fold the (8, TN) accumulator to a single lane-dense (8, 128)
        # vreg before writeback (16x less partials traffic at TN=2048).
        a = acc_ref[...]
        r = a[:, 0:128]
        for c in range(1, TN // 128):
            r = r + a[:, c * 128:(c + 1) * 128]
        out_ref[0] = r


def binary_focal_loss(y_pred_logits, y_true, alpha=0.25, gamma=2,
                      binary_labels=None):
    """Mean binary focal loss, matching the PyTorch module semantics.

    binary_labels: True  -> labels are hard {0,1} (enables the 2-transcendental
                            fast path),
                   False -> soft labels (exact exp(-bce) path),
                   None  -> auto: True iff y_true has an integer/bool dtype.
    """
    bs = y_pred_logits.shape[0]
    num_classes = y_pred_logits.shape[1]

    if binary_labels is None:
        binary_labels = (jnp.issubdtype(y_true.dtype, jnp.integer)
                         or jnp.issubdtype(y_true.dtype, jnp.bool_))
    binary_labels = bool(binary_labels)

    # bool has no clean TPU vector layout — store as int8 (same 1 B/elem).
    if jnp.issubdtype(y_true.dtype, jnp.bool_):
        y_true = y_true.astype(jnp.int8)

    # view(bs, num_classes, -1) -> 2-D slab (M, N).  No dtype upcast and no
    # padding in the wrapper: both are handled inside the kernel.
    M = bs * num_classes
    x2 = jnp.reshape(y_pred_logits, (M, -1))
    y2 = jnp.reshape(y_true, (M, -1))
    N = x2.shape[1]
    assert y2.shape == (M, N)

    # Sublane tiling minimum depends on the narrowest input dtype.
    def _sublane(dt):
        return {4: 8, 2: 16, 1: 32}.get(jnp.dtype(dt).itemsize, 8)
    sub = max(_sublane(x2.dtype), _sublane(y2.dtype), 8)

    # Lane-dense tiles.  TM=512/TN=2048 f32 -> 2 inputs x 2 buffers x 4 MiB
    # = 16 MiB of input double-buffers; vmem_limit below covers v5e's small
    # default while staying well under v7x's 64 MiB physical VMEM.
    TN = min(_round_up(N, 128), 2048)
    TM = min(_round_up(M, sub), 512)
    # v7x megacore: prefer >= 2 row blocks when M allows it so the "parallel"
    # axis can be sharded across both TensorCores (harmless on 1-TC chips).
    if M > sub and pl.cdiv(M, TM) < 2:
        tm_half = _round_up(pl.cdiv(M, 2), sub)
        if tm_half < TM:
            TM = tm_half
    grid = (pl.cdiv(M, TM), pl.cdiv(N, TN))

    kernel = functools.partial(
        _focal_partial_kernel,
        alpha=float(alpha), gamma=float(gamma), binary=binary_labels,
        M=M, N=N, TM=TM, TN=TN,
    )

    in_spec = pl.BlockSpec((TM, TN), lambda i, j: (i, j))
    out_spec = pl.BlockSpec((1, 8, 128), lambda i, j: (i, 0, 0))

    cost = pl.CostEstimate(
        flops=12 * M * N,
        transcendentals=(2 if binary_labels else 3) * M * N,
        bytes_accessed=(x2.size * x2.dtype.itemsize
                        + y2.size * y2.dtype.itemsize
                        + grid[0] * 8 * 128 * 4),
    )

    partials = pl.pallas_call(
        kernel,
        out_shape=jax.ShapeDtypeStruct((grid[0], 8, 128), jnp.float32),
        grid_spec=pltpu.PrefetchScalarGridSpec(
            num_scalar_prefetch=0,
            grid=grid,
            in_specs=[in_spec, in_spec],
            out_specs=out_spec,
            scratch_shapes=[pltpu.VMEM((8, TN), jnp.float32)],
        ),
        compiler_params=pltpu.CompilerParams(
            # Independent per-i partial outputs -> row-block axis can be
            # sharded across v7x's two TensorCores; reduction axis is last.
            dimension_semantics=("parallel", "arbitrary"),
            vmem_limit_bytes=40 << 20,
        ),
        cost_estimate=cost,
    )(x2, y2)

    # Tiny final reduction + mean in plain JAX.  Divisor as a Python float so
    # no integer->f32 precision loss when M*N > 2^24.
    total = jnp.sum(partials, dtype=jnp.float32)
    return (total * (1.0 / (float(M) * float(N)))).astype(jnp.float32)


def _reference(y_pred_logits, y_true, alpha=0.25, gamma=2):
    x = y_pred_logits.astype(jnp.float32)
    y = y_true.astype(jnp.float32)
    bce = jnp.maximum(x, 0.0) - x * y + jnp.log1p(jnp.exp(-jnp.abs(x)))
    pt = jnp.exp(-bce)
    return jnp.mean(alpha * (1.0 - pt) ** gamma * bce)


if __name__ == "__main__":
    key = jax.random.PRNGKey(0)
    k1, k2, k3, k4 = jax.random.split(key, 4)

    # Test 1: f32 logits + f32 {0,1} labels (default soft-label path, matches
    # the PyTorch module's .float() inputs exactly).
    B, C, H, W = 2, 4, 16, 16
    logits = jax.random.normal(k1, (B, C, H, W), dtype=jnp.float32)
    labels = (jax.random.uniform(k2, (B, C, H, W)) > 0.5).astype(jnp.float32)
    loss = jax.block_until_ready(binary_focal_loss(logits, labels, 0.25, 2))
    ref = _reference(logits, labels, 0.25, 2)
    assert jnp.allclose(loss, ref, rtol=1e-5, atol=1e-6), (loss, ref)

    # Test 2: bf16 logits + int8 hard labels (half the HBM bytes, 2-EUP path).
    B2, C2 = 2, 16
    logits2 = jax.random.normal(k3, (B2, C2, H, W), dtype=jnp.bfloat16)
    labels2 = (jax.random.uniform(k4, (B2, C2, H, W)) > 0.5).astype(jnp.int8)
    loss2 = jax.block_until_ready(binary_focal_loss(logits2, labels2, 0.25, 2))
    ref2 = _reference(logits2, labels2, 0.25, 2)
    assert jnp.allclose(loss2, ref2, rtol=2e-3, atol=1e-5), (loss2, ref2)

    print("KERNEL_OK")
</pallas_src>

<mosaic_0001>
module attributes {stable_mosaic.version = 11 : i64} {
  func.func @_focal_partial_kernel(%arg0: i32, %arg1: i32, %arg2: memref<8x256xf32, #tpu.memory_space<vmem>>, %arg3: memref<8x256xf32, #tpu.memory_space<vmem>>, %arg4: memref<1x8x128xf32, #tpu.memory_space<vmem>>, %arg5: memref<8x256xf32, #tpu.memory_space<vmem>>) attributes {dimension_semantics = [#tpu.dimension_semantics<parallel>, #tpu.dimension_semantics<arbitrary>], iteration_bounds = array<i64: 1, 1>, scalar_prefetch = 0 : i64, scratch_operands = 1 : i64, tpu.core_type = #tpu.core_type<tc>, window_params = [{transform_indices = @transform_0, window_bounds = array<i64: 8, 256>}, {transform_indices = @transform_1, window_bounds = array<i64: 8, 256>}, {transform_indices = @transform_2, window_bounds = array<i64: 1, 8, 128>}]} {
    %c0_i32 = arith.constant 0 : i32
    %0 = arith.cmpi eq, %arg1, %c0_i32 : i32
    %1 = arith.extui %0 : i1 to i32
    %c0_i32_0 = arith.constant 0 : i32
    %2 = arith.cmpi ne, %1, %c0_i32_0 : i32
    scf.if %2 {
      %cst_15 = arith.constant 0.000000e+00 : f32
      %32 = vector.broadcast %cst_15 : f32 to vector<8x256xf32>
      %c0_16 = arith.constant 0 : index
      %c0_17 = arith.constant 0 : index
      %33 = vector.load %arg5[%c0_16, %c0_17] : memref<8x256xf32, #tpu.memory_space<vmem>>, vector<8x256xf32>
      tpu.vector_store %arg5[%c0_16, %c0_17], %32 {strides = array<i32>} : memref<8x256xf32, #tpu.memory_space<vmem>>, vector<8x256xf32>,
    } else {
    }
    %c0 = arith.constant 0 : index
    %c0_1 = arith.constant 0 : index
    %3 = vector.load %arg2[%c0, %c0_1] : memref<8x256xf32, #tpu.memory_space<vmem>>, vector<8x256xf32>
    %c0_2 = arith.constant 0 : index
    %c0_3 = arith.constant 0 : index
    %4 = vector.load %arg3[%c0_2, %c0_3] : memref<8x256xf32, #tpu.memory_space<vmem>>, vector<8x256xf32>
    %5 = math.absf %3 : vector<8x256xf32>
    %cst = arith.constant 0.000000e+00 : f32
    %6 = vector.broadcast %cst : f32 to vector<8x256xf32>
    %7 = arith.subf %6, %5 : vector<8x256xf32>
    %8 = math.exp %7 : vector<8x256xf32>
    %cst_4 = arith.constant 0.000000e+00 : f32
    %9 = vector.broadcast %cst_4 : f32 to vector<8x256xf32>
    %10 = arith.maximumf %3, %9 : vector<8x256xf32>
    %11 = arith.mulf %3, %4 : vector<8x256xf32>
    %12 = arith.subf %10, %11 : vector<8x256xf32>
    %13 = math.log1p %8 : vector<8x256xf32>
    %14 = arith.addf %12, %13 : vector<8x256xf32>
    %cst_5 = arith.constant 0.000000e+00 : f32
    %15 = vector.broadcast %cst_5 : f32 to vector<8x256xf32>
    %16 = arith.subf %15, %14 : vector<8x256xf32>
    %17 = math.exp %16 : vector<8x256xf32>
    %cst_6 = arith.constant 1.000000e+00 : f32
    %18 = vector.broadcast %cst_6 : f32 to vector<8x256xf32>
    %19 = arith.subf %18, %17 : vector<8x256xf32>
    %cst_7 = arith.constant 0.000000e+00 : f32
    %20 = vector.broadcast %cst_7 : f32 to vector<8x256xf32>
    %21 = arith.maximumf %19, %20 : vector<8x256xf32>
    %22 = arith.mulf %21, %21 : vector<8x256xf32>
    %cst_8 = arith.constant 2.500000e-01 : f32
    %23 = vector.broadcast %cst_8 : f32 to vector<8x256xf32>
    %24 = arith.mulf %23, %22 : vector<8x256xf32>
    %25 = arith.mulf %24, %14 : vector<8x256xf32>
    %c0_9 = arith.constant 0 : index
    %c0_10 = arith.constant 0 : index
    %26 = vector.load %arg5[%c0_9, %c0_10] : memref<8x256xf32, #tpu.memory_space<vmem>>, vector<8x256xf32>
    %27 = arith.addf %26, %25 : vector<8x256xf32>
    %c0_11 = arith.constant 0 : index
    %c0_12 = arith.constant 0 : index
    %28 = vector.load %arg5[%c0_11, %c0_12] : memref<8x256xf32, #tpu.memory_space<vmem>>, vector<8x256xf32>
    tpu.vector_store %arg5[%c0_11, %c0_12], %27 {strides = array<i32>} : memref<8x256xf32, #tpu.memory_space<vmem>>, vector<8x256xf32>,
    %c0_i32_13 = arith.constant 0 : i32
    %29 = arith.cmpi eq, %arg1, %c0_i32_13 : i32
    %30 = arith.extui %29 : i1 to i32
    %c0_i32_14 = arith.constant 0 : i32
    %31 = arith.cmpi ne, %30, %c0_i32_14 : i32
    scf.if %31 {
      %c0_15 = arith.constant 0 : index
      %c0_16 = arith.constant 0 : index
      %32 = vector.load %arg5[%c0_15, %c0_16] : memref<8x256xf32, #tpu.memory_space<vmem>>, vector<8x256xf32>
      %33 = vector.extract_strided_slice %32 {offsets = [0, 0], sizes = [8, 128], strides = [1, 1]} : vector<8x256xf32> to vector<8x128xf32>
      %34 = vector.extract_strided_slice %32 {offsets = [0, 128], sizes = [8, 128], strides = [1, 1]} : vector<8x256xf32> to vector<8x128xf32>
      %35 = arith.addf %33, %34 : vector<8x128xf32>
      %c0_17 = arith.constant 0 : index
      %c0_18 = arith.constant 0 : index
      %c0_19 = arith.constant 0 : index
      %36 = vector.load %arg4[%c0_17, %c0_18, %c0_19] : memref<1x8x128xf32, #tpu.memory_space<vmem>>, vector<1x8x128xf32>
      %37 = vector.shape_cast %36 : vector<1x8x128xf32> to vector<8x128xf32>
      %38 = vector.shape_cast %35 : vector<8x128xf32> to vector<1x8x128xf32>
      tpu.vector_store %arg4[%c0_17, %c0_18, %c0_19], %38 {strides = array<i32>} : memref<1x8x128xf32, #tpu.memory_space<vmem>>, vector<1x8x128xf32>,
    } else {
    }
    return
  }
  func.func @transform_0(%arg0: i32, %arg1: i32) -> (i32, i32) {
    %c0_i32 = arith.constant 0 : i32
    return %arg0, %arg1 : i32, i32
  }
  func.func @transform_1(%arg0: i32, %arg1: i32) -> (i32, i32) {
    %c0_i32 = arith.constant 0 : i32
    return %arg0, %arg1 : i32, i32
  }
  func.func @transform_2(%arg0: i32, %arg1: i32) -> (i32, i32, i32) {
    %c0_i32 = arith.constant 0 : i32
    %c0_i32_0 = arith.constant 0 : i32
    %c0_i32_1 = arith.constant 0 : i32
    return %arg0, %c0_i32, %c0_i32_0 : i32, i32, i32
  }
}

</mosaic_0001>

<bundles_post_ra>
// kernel: tpu_custom_call.1
= control target key start
LH: loop header
LB: loop body
LE: loop exit
PB: predicated region body
PF: predicated region fallthrough
CT: control target
= control target key end

     0   :  { %7 = vsyncpa [#allocation4], 0  ;;  %s266_s0 = inlined_call_operand.hbm [shape: f32[8,256], index: 0, kind: input, shape index: {}]   ;;  %s267_s1 = inlined_call_operand.hbm [shape: f32[8,256], index: 1, kind: input, shape index: {}]   ;;  %s268_s2 = inlined_call_operand.hbm [shape: f32[1,8,128], index: 2, kind: output, shape index: {}]  }
   0x1   :  { %8 = vsyncpa [#allocation7], 0 }
   0x2   :  { %9 = vsyncpa [#allocation5], 0  ;;  %s212_s9 = smov [#allocation3]   ;;  %s213_s11 = smov [#allocation6]  }
   0x3   :  { %s16_s10 = sshll.u32 %s212_s9, 4  ;;  %s26_s12 = sshll.u32 %s213_s11, 4  ;;  %s17_s10 = int_to_ptr.vmem [resolvable:$true] %s16_s10  ;;  %s27_s12 = int_to_ptr.vmem [resolvable:$true] %s26_s12 }
   0x4   :  { %s140_s15 = scalar_lea.hbm %s266_s0, 256 }
   0x5   :  { %p141_p0 = scmp.ne.s32.totalorder %s266_s0, %s140_s15  ;;  %p144_p1 = scmp.lt.u32.totalorder %s140_s15, %s266_s0 }
   0x7   :  { %p146_p2 = pnand %p144_p1, %p141_p0 }
   0x9   :  { %149 = shalt.err (!%p146_p2)
}
   0xa   :  { %s150_s20 = scalar_lea.vmem %s17_s10, 256  ;;  %p155_p4 = scmp.lt.s32.totalorder %s17_s10, %s17_s10 }
   0xb   :  { %p151_p3 = scmp.ne.s32.totalorder %s17_s10, %s150_s20  ;;  %p156_p5 = scmp.lt.s32.totalorder %s150_s20, %s150_s20 }
   0xd   :  { %p157_p6 = por %p156_p5, %p155_p4 }
   0xf   :  { %p158_p7 = pnand %p157_p6, %p151_p3 }
  0x11   :  { %161 = shalt.err (!%p158_p7)
}
  0x12   :  { %19 = dma.hbm_to_vmem [thread:$0]  %s266_s0, 256, %s17_s10, [#allocation4]  }
  0x13   :  { %s162_s25 = scalar_lea.hbm %s267_s1, 256 }
  0x14   :  { %p163_p8 = scmp.ne.s32.totalorder %s267_s1, %s162_s25  ;;  %p166_p9 = scmp.lt.u32.totalorder %s162_s25, %s267_s1 }
  0x16   :  { %p168_p10 = pnand %p166_p9, %p163_p8 }
  0x18   :  { %171 = shalt.err (!%p168_p10)
}
  0x19   :  { %s172_s30 = scalar_lea.vmem %s27_s12, 256  ;;  %p177_p12 = scmp.lt.s32.totalorder %s27_s12, %s27_s12 }
  0x1a   :  { %p173_p11 = scmp.ne.s32.totalorder %s27_s12, %s172_s30  ;;  %p178_p13 = scmp.lt.s32.totalorder %s172_s30, %s172_s30 }
  0x1c   :  { %p179_p0 = por %p178_p13, %p177_p12 }
  0x1e   :  { %p180_p1 = pnand %p179_p0, %p173_p11 }
  0x20   :  { %183 = shalt.err (!%p180_p1)
}
  0x21   :  { %29 = dma.hbm_to_vmem [thread:$0]  %s267_s1, 256, %s27_s12, [#allocation7]  }
  0x22   :  { %206 = dma.done.wait [#allocation4], 256  }
  0x23   :  { %207 = vsyncadd [#allocation4], 4294967040 }
  0x24   :  { %208 = dma.done.wait [#allocation7], 256  }
  0x25   :  { %209 = vsyncadd [#allocation7], 4294967040  ;;  %v42_v0 = vld [vmem:[#allocation3] sm:$0xff]  ;;  %v43_v1 = vld [vmem:[#allocation3 + $0x8] sm:$0xff]  ;;  %s214_s1 = smov [#allocation8]  }
  0x26   :  { %v46_v2 = vand.u32 2147483647, %v42_v0  ;;  %v47_v3 = vand.u32 2147483647, %v43_v1  ;;  %v44_v14 = vld [vmem:[#allocation6] sm:$0xff]  ;;  %v45_v15 = vld [vmem:[#allocation6 + $0x8] sm:$0xff] }
  0x27   :  { %v54_v17 = vmax.f32 %v42_v0, 0.0  ;;  %v56_v18 = vmul.f32 %v44_v14, %v42_v0  ;;  %v55_v21 = vmax.f32 %v43_v1, 0.0  ;;  %v57_v22 = vmul.f32 %v45_v15, %v43_v1  ;;  %s115_s4 = sshll.u32 %s214_s1, 4  ;;  %s116_s4 = int_to_ptr.vmem [resolvable:$true] %s115_s4 }
  0x28   :  { %v48_v4 = vsub.f32 0.0, %v46_v2  ;;  %v49_v5 = vsub.f32 0.0, %v47_v3  ;;  %s184_s5 = scalar_lea.vmem %s116_s4, 128  ;;  %p189_p3 = scmp.lt.s32.totalorder %s116_s4, %s116_s4 }
  0x29   :  { %v58_v26 = vsub.f32 %v54_v17, %v56_v18  ;;  %v59_v29 = vsub.f32 %v55_v21, %v57_v22  ;;  %p185_p2 = scmp.ne.s32.totalorder %s116_s4, %s184_s5  ;;  %p190_p4 = scmp.lt.s32.totalorder %s184_s5, %s184_s5 }
  0x2a   :  { %v50_v6 = vmul.f32 1.442695, %v48_v4  ;;  %v52_v7 = vmul.f32 1.442695, %v49_v5 }
  0x2b   :  { %p191_p5 = por %p190_p4, %p189_p3 }
  0x2c   :  { %128 = vpow2.f32 %v50_v6 }
  0x2d   :  { %130 = vpow2.f32 %v52_v7  ;;  %p192_p6 = pnand %p191_p5, %p185_p2 }
  0x36   :  { %v129_v8 = vpop.eup %128 }
  0x37   :  { %v131_v9 = vpop.eup %130  ;;  %v60_v10 = vadd.f32 1.0, %v129_v8  ;;  %v63_v12 = vmul.f32 -0.5, %v129_v8  ;;  %v66_v19 = vand.u32 2147483647, %v129_v8 }
  0x38   :  { %v69_v11 = vadd.f32 1.0, %v131_v9  ;;  %v72_v13 = vmul.f32 -0.5, %v131_v9  ;;  %v75_v23 = vand.u32 2147483647, %v131_v9 }
  0x39   :  { %132 = vlog2.f32 %v60_v10  ;;  %v64_v16 = vadd.f32 1.0, %v63_v12  ;;  %vm67_vm0 = vcmp.lt.f32.partialorder %v66_v19, 0.0004427343 }
  0x3a   :  { %134 = vlog2.f32 %v69_v11  ;;  %v73_v20 = vadd.f32 1.0, %v72_v13  ;;  %vm76_vm1 = vcmp.lt.f32.partialorder %v75_v23, 0.0004427343 }
  0x3b   :  { %v65_v24 = vmul.f32 %v129_v8, %v64_v16 }
  0x3c   :  { %v74_v27 = vmul.f32 %v131_v9, %v73_v20 }
  0x43   :  { %v133_v25 = vpop.eup %132 }
  0x44   :  { %v135_v28 = vpop.eup %134  ;;  %v62_v30 = vmul.f32 0.6931472, %v133_v25 }
  0x45   :  { %v71_v31 = vmul.f32 0.6931472, %v135_v28 }
  0x46   :  { %v68_v32 = vsel %vm67_vm0, %v65_v24, %v62_v30 }
  0x47   :  { %v77_v33 = vsel %vm76_vm1, %v74_v27, %v71_v31  ;;  %v78_v34 = vadd.f32 %v68_v32, %v58_v26 }
  0x48   :  { %v79_v35 = vadd.f32 %v77_v33, %v59_v29 }
  0x49   :  { %v80_v36 = vsub.f32 0.0, %v78_v34 }
  0x4a   :  { %v81_v37 = vsub.f32 0.0, %v79_v35 }
  0x4b   :  { %v82_v38 = vmul.f32 1.442695, %v80_v36 }
  0x4c   :  { %v84_v39 = vmul.f32 1.442695, %v81_v37 }
  0x4d   :  { %136 = vpow2.f32 %v82_v38 }
  0x4e   :  { %138 = vpow2.f32 %v84_v39 }
  0x57   :  { %v137_v40 = vpop.eup %136 }
  0x58   :  { %v139_v41 = vpop.eup %138  ;;  %v86_v42 = vsub.f32 1.0, %v137_v40 }
  0x59   :  { %v87_v43 = vsub.f32 1.0, %v139_v41 }
  0x5a   :  { %v88_v44 = vmax.f32 %v86_v42, 0.0 }
  0x5b   :  { %v89_v45 = vmax.f32 %v87_v43, 0.0 }
  0x5c   :  { %v90_v46 = vmul.f32 %v88_v44, %v88_v44 }
  0x5d   :  { %v91_v47 = vmul.f32 %v89_v45, %v89_v45 }
  0x5e   :  { %v92_v48 = vmul.f32 0.25, %v90_v46 }
  0x5f   :  { %v93_v49 = vmul.f32 0.25, %v91_v47 }
  0x60   :  { %v94_v50 = vmul.f32 %v92_v48, %v78_v34 }
  0x61   :  { %v95_v51 = vmul.f32 %v93_v49, %v79_v35 }
  0x63   :  { %v107_v52 = vadd.f32 %v95_v51, %v94_v50 }
  0x65   :  { %108 = vst [vmem:[#allocation8] sm:$0xff] %v107_v52 }
  0x66   :  { %195 = shalt.err (!%p192_p6)
}
  0x67   :  { %s196_s8 = scalar_lea.hbm %s268_s2, 128 }
  0x68   :  { %p197_p7 = scmp.ne.s32.totalorder %s268_s2, %s196_s8  ;;  %p200_p8 = scmp.lt.u32.totalorder %s196_s8, %s268_s2 }
  0x6a   :  { %p202_p9 = pnand %p200_p8, %p197_p7 }
  0x6c   :  { %205 = shalt.err (!%p202_p9)
}
  0x6d   :  { %118 = dma.vmem_to_hbm [thread:$0]  %s116_s4, 128, %s268_s2, [#allocation5]  }
  0x6e   :  { %210 = dma.done.wait [#allocation5], 128  }
  0x6f   :  { %211 = vsyncadd [#allocation5], 4294967168 }
  0x70   :  { %122 = vsyncpa [#allocation4], 1 }
  0x71   :  { %123 = vsyncpa [#allocation7], 1 }
  0x72   :  { %124 = vsyncpa [#allocation5], 1 }

</bundles_post_ra>
